<compile_context>
chip_gen: v7x
topology: tpu7x:2x2x1
jax: 0.10.0
libtpu: 0.0.40
codegen_flags: <defaults>
</compile_context>

<pallas_src>
import functools

import jax
import jax.numpy as jnp
from jax.experimental import pallas as pl
from jax.experimental.pallas import tpu as pltpu

_GOLDEN = 0x9E3779B9  # odd 32-bit constant (golden-ratio)


def _round_up(a, b):
    return ((a + b - 1) // b) * b


def _fmix32(h):
    """murmur3 32-bit finalizer: good avalanche, pure VPU int ops."""
    h = h ^ (h >> 16)
    h = h * jnp.uint32(0x85EBCA6B)
    h = h ^ (h >> 13)
    h = h * jnp.uint32(0xC2B2AE35)
    h = h ^ (h >> 16)
    return h


def _gaussian_noise_kernel(seed_ref, x_ref, o_ref, *, sigma):
    tile_r, lanes = x_ref.shape
    row0 = pl.program_id(0) * tile_r

    # Unique global element index per slot -> every tile gets distinct noise.
    ridx = jax.lax.broadcasted_iota(jnp.int32, (tile_r, lanes), 0)
    cidx = jax.lax.broadcasted_iota(jnp.int32, (tile_r, lanes), 1)
    gidx = ((ridx + row0) * lanes + cidx).astype(jnp.uint32)

    seed_u = seed_ref[0].astype(jnp.uint32)
    base = gidx ^ (seed_u * jnp.uint32(_GOLDEN) + jnp.uint32(0x7F4A7C15))

    # Counter-based PRNG + CLT-12: 6 hashes -> 12 x 16-bit uniforms;
    # sum(u) - 6 ~ N(0, 1) (exact mean 0, unit variance).  No EUP / transcendentals.
    acc = jnp.zeros((tile_r, lanes), jnp.float32)
    for k in range(6):
        h = _fmix32(base + jnp.uint32(((k + 1) * _GOLDEN) & 0xFFFFFFFF))
        lo = (h & jnp.uint32(0xFFFF)).astype(jnp.int32).astype(jnp.float32)
        hi = (h >> 16).astype(jnp.int32).astype(jnp.float32)
        acc = acc + lo + hi
    unit_normal = (acc + 6.0) * jnp.float32(1.0 / 65536.0) - 6.0

    x_f32 = x_ref[...].astype(jnp.float32)
    o_ref[...] = (x_f32 + jnp.float32(sigma) * unit_normal).astype(o_ref.dtype)


def gaussian_noise(x, sigma, seed=0):
    """Pallas equivalent of GaussianNoise.forward: returns x + N(0, sigma)."""
    orig_shape = x.shape
    total = int(x.size)
    elem_bytes = x.dtype.itemsize

    # Lane-dense 2-D slab independent of H*W: widest lane count with >= 8 rows.
    lanes = 128
    for cand in (1024, 512, 256, 128):
        if total >= 8 * cand:
            lanes = cand
            break
    rows = pl.cdiv(total, lanes)

    # ~2 MiB per block: in+out double-buffering stays well under the scoped
    # VMEM limit on all chips (incl. v7x's 64 MiB physical / 32 MiB scoped).
    tile_r = max(8, ((2 * 1024 * 1024) // (lanes * elem_bytes)) // 8 * 8)
    tile_r = min(tile_r, _round_up(rows, 8))
    rows_padded = _round_up(rows, tile_r)
    padded_total = rows_padded * lanes

    xf = jnp.ravel(x)
    if padded_total != total:
        xf = jnp.pad(xf, (0, padded_total - total))
    x2 = xf.reshape(rows_padded, lanes)

    seed_arr = jnp.asarray([seed], dtype=jnp.int32)
    kernel = functools.partial(_gaussian_noise_kernel, sigma=float(sigma))

    grid = (rows_padded // tile_r,)
    cost = pl.CostEstimate(
        flops=40 * padded_total,                       # hash + CLT sum + add
        transcendentals=0,
        bytes_accessed=2 * padded_total * elem_bytes,  # read x + write out
    )

    out2 = pl.pallas_call(
        kernel,
        out_shape=jax.ShapeDtypeStruct((rows_padded, lanes), x.dtype),
        grid_spec=pltpu.PrefetchScalarGridSpec(
            num_scalar_prefetch=1,
            grid=grid,
            in_specs=[pl.BlockSpec((tile_r, lanes), lambda i, seed_ref: (i, 0))],
            out_specs=pl.BlockSpec((tile_r, lanes), lambda i, seed_ref: (i, 0)),
        ),
        compiler_params=pltpu.CompilerParams(
            dimension_semantics=("parallel",),
        ),
        cost_estimate=cost,
    )(seed_arr, x2)

    out = out2.reshape(-1)
    if padded_total != total:
        out = out[:total]
    return out.reshape(orig_shape)


if __name__ == "__main__":
    key = jax.random.PRNGKey(0)
    # Small NCHW input consistent with the module's usage.
    x = jax.random.normal(key, (2, 4, 16, 16), dtype=jnp.float32)
    sigma = 0.1

    y = gaussian_noise(x, sigma, seed=0)
    y = jax.block_until_ready(y)

    assert y.shape == x.shape and y.dtype == x.dtype
    assert bool(jnp.all(jnp.isfinite(y)))
    # Added noise has std ~ sigma and is bounded by 6*sigma = 0.6 (CLT-12).
    assert float(jnp.max(jnp.abs(y - x))) < 1.0
    # Sanity on noise statistics.
    noise = y - x
    assert abs(float(jnp.mean(noise))) < 0.02
    assert 0.05 < float(jnp.std(noise)) < 0.2

    print("KERNEL_OK")
</pallas_src>

<mosaic_0001>
module attributes {stable_mosaic.version = 11 : i64} {
  func.func @_gaussian_noise_kernel(%arg0: i32, %arg1: memref<1xi32, #tpu.memory_space<smem>>, %arg2: memref<8x256xf32, #tpu.memory_space<vmem>>, %arg3: memref<8x256xf32, #tpu.memory_space<vmem>>) attributes {dimension_semantics = [#tpu.dimension_semantics<parallel>], iteration_bounds = array<i64: 1>, scalar_prefetch = 1 : i64, scratch_operands = 0 : i64, tpu.core_type = #tpu.core_type<tc>, window_params = [{transform_indices = @transform_0, window_bounds = array<i64: 8, 256>}, {transform_indices = @transform_1, window_bounds = array<i64: 8, 256>}]} {
    %c8_i32 = arith.constant 8 : i32
    %0 = arith.muli %arg0, %c8_i32 : i32
    %1 = tpu.iota {dimensions = array<i32: 0>} : vector<8x256xi32>
    %2 = tpu.iota {dimensions = array<i32: 1>} : vector<8x256xi32>
    %3 = vector.broadcast %0 : i32 to vector<8x256xi32>
    %4 = arith.addi %1, %3 : vector<8x256xi32>
    %c256_i32 = arith.constant 256 : i32
    %5 = vector.broadcast %c256_i32 : i32 to vector<8x256xi32>
    %6 = arith.muli %4, %5 : vector<8x256xi32>
    %7 = arith.addi %6, %2 : vector<8x256xi32>
    %c0 = arith.constant 0 : index
    %8 = memref.load %arg1[%c0] : memref<1xi32, #tpu.memory_space<smem>>
    %c-1640531527_i32 = arith.constant -1640531527 : i32
    %9 = arith.muli %8, %c-1640531527_i32 : i32
    %c2135587861_i32 = arith.constant 2135587861 : i32
    %10 = arith.addi %9, %c2135587861_i32 : i32
    %11 = vector.broadcast %10 : i32 to vector<8x256xi32>
    %12 = arith.xori %7, %11 : vector<8x256xi32>
    %cst = arith.constant 0.000000e+00 : f32
    %13 = vector.broadcast %cst : f32 to vector<8x256xf32>
    %c-1640531527_i32_0 = arith.constant -1640531527 : i32
    %14 = vector.broadcast %c-1640531527_i32_0 : i32 to vector<8x256xi32>
    %15 = arith.addi %12, %14 : vector<8x256xi32>
    %c16_i32 = arith.constant 16 : i32
    %16 = vector.broadcast %c16_i32 : i32 to vector<8x256xi32>
    %17 = arith.shrui %15, %16 : vector<8x256xi32>
    %18 = arith.xori %15, %17 : vector<8x256xi32>
    %c-2048144789_i32 = arith.constant -2048144789 : i32
    %19 = vector.broadcast %c-2048144789_i32 : i32 to vector<8x256xi32>
    %20 = arith.muli %18, %19 : vector<8x256xi32>
    %c13_i32 = arith.constant 13 : i32
    %21 = vector.broadcast %c13_i32 : i32 to vector<8x256xi32>
    %22 = arith.shrui %20, %21 : vector<8x256xi32>
    %23 = arith.xori %20, %22 : vector<8x256xi32>
    %c-1028477387_i32 = arith.constant -1028477387 : i32
    %24 = vector.broadcast %c-1028477387_i32 : i32 to vector<8x256xi32>
    %25 = arith.muli %23, %24 : vector<8x256xi32>
    %c16_i32_1 = arith.constant 16 : i32
    %26 = vector.broadcast %c16_i32_1 : i32 to vector<8x256xi32>
    %27 = arith.shrui %25, %26 : vector<8x256xi32>
    %28 = arith.xori %25, %27 : vector<8x256xi32>
    %c65535_i32 = arith.constant 65535 : i32
    %29 = vector.broadcast %c65535_i32 : i32 to vector<8x256xi32>
    %30 = arith.andi %28, %29 : vector<8x256xi32>
    %31 = arith.sitofp %30 : vector<8x256xi32> to vector<8x256xf32>
    %c16_i32_2 = arith.constant 16 : i32
    %32 = vector.broadcast %c16_i32_2 : i32 to vector<8x256xi32>
    %33 = arith.shrui %28, %32 : vector<8x256xi32>
    %34 = arith.sitofp %33 : vector<8x256xi32> to vector<8x256xf32>
    %35 = arith.addf %13, %31 : vector<8x256xf32>
    %36 = arith.addf %35, %34 : vector<8x256xf32>
    %c1013904242_i32 = arith.constant 1013904242 : i32
    %37 = vector.broadcast %c1013904242_i32 : i32 to vector<8x256xi32>
    %38 = arith.addi %12, %37 : vector<8x256xi32>
    %c16_i32_3 = arith.constant 16 : i32
    %39 = vector.broadcast %c16_i32_3 : i32 to vector<8x256xi32>
    %40 = arith.shrui %38, %39 : vector<8x256xi32>
    %41 = arith.xori %38, %40 : vector<8x256xi32>
    %c-2048144789_i32_4 = arith.constant -2048144789 : i32
    %42 = vector.broadcast %c-2048144789_i32_4 : i32 to vector<8x256xi32>
    %43 = arith.muli %41, %42 : vector<8x256xi32>
    %c13_i32_5 = arith.constant 13 : i32
    %44 = vector.broadcast %c13_i32_5 : i32 to vector<8x256xi32>
    %45 = arith.shrui %43, %44 : vector<8x256xi32>
    %46 = arith.xori %43, %45 : vector<8x256xi32>
    %c-1028477387_i32_6 = arith.constant -1028477387 : i32
    %47 = vector.broadcast %c-1028477387_i32_6 : i32 to vector<8x256xi32>
    %48 = arith.muli %46, %47 : vector<8x256xi32>
    %c16_i32_7 = arith.constant 16 : i32
    %49 = vector.broadcast %c16_i32_7 : i32 to vector<8x256xi32>
    %50 = arith.shrui %48, %49 : vector<8x256xi32>
    %51 = arith.xori %48, %50 : vector<8x256xi32>
    %c65535_i32_8 = arith.constant 65535 : i32
    %52 = vector.broadcast %c65535_i32_8 : i32 to vector<8x256xi32>
    %53 = arith.andi %51, %52 : vector<8x256xi32>
    %54 = arith.sitofp %53 : vector<8x256xi32> to vector<8x256xf32>
    %c16_i32_9 = arith.constant 16 : i32
    %55 = vector.broadcast %c16_i32_9 : i32 to vector<8x256xi32>
    %56 = arith.shrui %51, %55 : vector<8x256xi32>
    %57 = arith.sitofp %56 : vector<8x256xi32> to vector<8x256xf32>
    %58 = arith.addf %36, %54 : vector<8x256xf32>
    %59 = arith.addf %58, %57 : vector<8x256xf32>
    %c-626627285_i32 = arith.constant -626627285 : i32
    %60 = vector.broadcast %c-626627285_i32 : i32 to vector<8x256xi32>
    %61 = arith.addi %12, %60 : vector<8x256xi32>
    %c16_i32_10 = arith.constant 16 : i32
    %62 = vector.broadcast %c16_i32_10 : i32 to vector<8x256xi32>
    %63 = arith.shrui %61, %62 : vector<8x256xi32>
    %64 = arith.xori %61, %63 : vector<8x256xi32>
    %c-2048144789_i32_11 = arith.constant -2048144789 : i32
    %65 = vector.broadcast %c-2048144789_i32_11 : i32 to vector<8x256xi32>
    %66 = arith.muli %64, %65 : vector<8x256xi32>
    %c13_i32_12 = arith.constant 13 : i32
    %67 = vector.broadcast %c13_i32_12 : i32 to vector<8x256xi32>
    %68 = arith.shrui %66, %67 : vector<8x256xi32>
    %69 = arith.xori %66, %68 : vector<8x256xi32>
    %c-1028477387_i32_13 = arith.constant -1028477387 : i32
    %70 = vector.broadcast %c-1028477387_i32_13 : i32 to vector<8x256xi32>
    %71 = arith.muli %69, %70 : vector<8x256xi32>
    %c16_i32_14 = arith.constant 16 : i32
    %72 = vector.broadcast %c16_i32_14 : i32 to vector<8x256xi32>
    %73 = arith.shrui %71, %72 : vector<8x256xi32>
    %74 = arith.xori %71, %73 : vector<8x256xi32>
    %c65535_i32_15 = arith.constant 65535 : i32
    %75 = vector.broadcast %c65535_i32_15 : i32 to vector<8x256xi32>
    %76 = arith.andi %74, %75 : vector<8x256xi32>
    %77 = arith.sitofp %76 : vector<8x256xi32> to vector<8x256xf32>
    %c16_i32_16 = arith.constant 16 : i32
    %78 = vector.broadcast %c16_i32_16 : i32 to vector<8x256xi32>
    %79 = arith.shrui %74, %78 : vector<8x256xi32>
    %80 = arith.sitofp %79 : vector<8x256xi32> to vector<8x256xf32>
    %81 = arith.addf %59, %77 : vector<8x256xf32>
    %82 = arith.addf %81, %80 : vector<8x256xf32>
    %c2027808484_i32 = arith.constant 2027808484 : i32
    %83 = vector.broadcast %c2027808484_i32 : i32 to vector<8x256xi32>
    %84 = arith.addi %12, %83 : vector<8x256xi32>
    %c16_i32_17 = arith.constant 16 : i32
    %85 = vector.broadcast %c16_i32_17 : i32 to vector<8x256xi32>
    %86 = arith.shrui %84, %85 : vector<8x256xi32>
    %87 = arith.xori %84, %86 : vector<8x256xi32>
    %c-2048144789_i32_18 = arith.constant -2048144789 : i32
    %88 = vector.broadcast %c-2048144789_i32_18 : i32 to vector<8x256xi32>
    %89 = arith.muli %87, %88 : vector<8x256xi32>
    %c13_i32_19 = arith.constant 13 : i32
    %90 = vector.broadcast %c13_i32_19 : i32 to vector<8x256xi32>
    %91 = arith.shrui %89, %90 : vector<8x256xi32>
    %92 = arith.xori %89, %91 : vector<8x256xi32>
    %c-1028477387_i32_20 = arith.constant -1028477387 : i32
    %93 = vector.broadcast %c-1028477387_i32_20 : i32 to vector<8x256xi32>
    %94 = arith.muli %92, %93 : vector<8x256xi32>
    %c16_i32_21 = arith.constant 16 : i32
    %95 = vector.broadcast %c16_i32_21 : i32 to vector<8x256xi32>
    %96 = arith.shrui %94, %95 : vector<8x256xi32>
    %97 = arith.xori %94, %96 : vector<8x256xi32>
    %c65535_i32_22 = arith.constant 65535 : i32
    %98 = vector.broadcast %c65535_i32_22 : i32 to vector<8x256xi32>
    %99 = arith.andi %97, %98 : vector<8x256xi32>
    %100 = arith.sitofp %99 : vector<8x256xi32> to vector<8x256xf32>
    %c16_i32_23 = arith.constant 16 : i32
    %101 = vector.broadcast %c16_i32_23 : i32 to vector<8x256xi32>
    %102 = arith.shrui %97, %101 : vector<8x256xi32>
    %103 = arith.sitofp %102 : vector<8x256xi32> to vector<8x256xf32>
    %104 = arith.addf %82, %100 : vector<8x256xf32>
    %105 = arith.addf %104, %103 : vector<8x256xf32>
    %c387276957_i32 = arith.constant 387276957 : i32
    %106 = vector.broadcast %c387276957_i32 : i32 to vector<8x256xi32>
    %107 = arith.addi %12, %106 : vector<8x256xi32>
    %c16_i32_24 = arith.constant 16 : i32
    %108 = vector.broadcast %c16_i32_24 : i32 to vector<8x256xi32>
    %109 = arith.shrui %107, %108 : vector<8x256xi32>
    %110 = arith.xori %107, %109 : vector<8x256xi32>
    %c-2048144789_i32_25 = arith.constant -2048144789 : i32
    %111 = vector.broadcast %c-2048144789_i32_25 : i32 to vector<8x256xi32>
    %112 = arith.muli %110, %111 : vector<8x256xi32>
    %c13_i32_26 = arith.constant 13 : i32
    %113 = vector.broadcast %c13_i32_26 : i32 to vector<8x256xi32>
    %114 = arith.shrui %112, %113 : vector<8x256xi32>
    %115 = arith.xori %112, %114 : vector<8x256xi32>
    %c-1028477387_i32_27 = arith.constant -1028477387 : i32
    %116 = vector.broadcast %c-1028477387_i32_27 : i32 to vector<8x256xi32>
    %117 = arith.muli %115, %116 : vector<8x256xi32>
    %c16_i32_28 = arith.constant 16 : i32
    %118 = vector.broadcast %c16_i32_28 : i32 to vector<8x256xi32>
    %119 = arith.shrui %117, %118 : vector<8x256xi32>
    %120 = arith.xori %117, %119 : vector<8x256xi32>
    %c65535_i32_29 = arith.constant 65535 : i32
    %121 = vector.broadcast %c65535_i32_29 : i32 to vector<8x256xi32>
    %122 = arith.andi %120, %121 : vector<8x256xi32>
    %123 = arith.sitofp %122 : vector<8x256xi32> to vector<8x256xf32>
    %c16_i32_30 = arith.constant 16 : i32
    %124 = vector.broadcast %c16_i32_30 : i32 to vector<8x256xi32>
    %125 = arith.shrui %120, %124 : vector<8x256xi32>
    %126 = arith.sitofp %125 : vector<8x256xi32> to vector<8x256xf32>
    %127 = arith.addf %105, %123 : vector<8x256xf32>
    %128 = arith.addf %127, %126 : vector<8x256xf32>
    %c-1253254570_i32 = arith.constant -1253254570 : i32
    %129 = vector.broadcast %c-1253254570_i32 : i32 to vector<8x256xi32>
    %130 = arith.addi %12, %129 : vector<8x256xi32>
    %c16_i32_31 = arith.constant 16 : i32
    %131 = vector.broadcast %c16_i32_31 : i32 to vector<8x256xi32>
    %132 = arith.shrui %130, %131 : vector<8x256xi32>
    %133 = arith.xori %130, %132 : vector<8x256xi32>
    %c-2048144789_i32_32 = arith.constant -2048144789 : i32
    %134 = vector.broadcast %c-2048144789_i32_32 : i32 to vector<8x256xi32>
    %135 = arith.muli %133, %134 : vector<8x256xi32>
    %c13_i32_33 = arith.constant 13 : i32
    %136 = vector.broadcast %c13_i32_33 : i32 to vector<8x256xi32>
    %137 = arith.shrui %135, %136 : vector<8x256xi32>
    %138 = arith.xori %135, %137 : vector<8x256xi32>
    %c-1028477387_i32_34 = arith.constant -1028477387 : i32
    %139 = vector.broadcast %c-1028477387_i32_34 : i32 to vector<8x256xi32>
    %140 = arith.muli %138, %139 : vector<8x256xi32>
    %c16_i32_35 = arith.constant 16 : i32
    %141 = vector.broadcast %c16_i32_35 : i32 to vector<8x256xi32>
    %142 = arith.shrui %140, %141 : vector<8x256xi32>
    %143 = arith.xori %140, %142 : vector<8x256xi32>
    %c65535_i32_36 = arith.constant 65535 : i32
    %144 = vector.broadcast %c65535_i32_36 : i32 to vector<8x256xi32>
    %145 = arith.andi %143, %144 : vector<8x256xi32>
    %146 = arith.sitofp %145 : vector<8x256xi32> to vector<8x256xf32>
    %c16_i32_37 = arith.constant 16 : i32
    %147 = vector.broadcast %c16_i32_37 : i32 to vector<8x256xi32>
    %148 = arith.shrui %143, %147 : vector<8x256xi32>
    %149 = arith.sitofp %148 : vector<8x256xi32> to vector<8x256xf32>
    %150 = arith.addf %128, %146 : vector<8x256xf32>
    %151 = arith.addf %150, %149 : vector<8x256xf32>
    %cst_38 = arith.constant 6.000000e+00 : f32
    %152 = vector.broadcast %cst_38 : f32 to vector<8x256xf32>
    %153 = arith.addf %151, %152 : vector<8x256xf32>
    %cst_39 = arith.constant 1.52587891E-5 : f32
    %154 = vector.broadcast %cst_39 : f32 to vector<8x256xf32>
    %155 = arith.mulf %153, %154 : vector<8x256xf32>
    %cst_40 = arith.constant 6.000000e+00 : f32
    %156 = vector.broadcast %cst_40 : f32 to vector<8x256xf32>
    %157 = arith.subf %155, %156 : vector<8x256xf32>
    %c0_41 = arith.constant 0 : index
    %c0_42 = arith.constant 0 : index
    %158 = vector.load %arg2[%c0_41, %c0_42] : memref<8x256xf32, #tpu.memory_space<vmem>>, vector<8x256xf32>
    %cst_43 = arith.constant 1.000000e-01 : f32
    %159 = vector.broadcast %cst_43 : f32 to vector<8x256xf32>
    %160 = arith.mulf %159, %157 : vector<8x256xf32>
    %161 = arith.addf %158, %160 : vector<8x256xf32>
    %c0_44 = arith.constant 0 : index
    %c0_45 = arith.constant 0 : index
    %162 = vector.load %arg3[%c0_44, %c0_45] : memref<8x256xf32, #tpu.memory_space<vmem>>, vector<8x256xf32>
    tpu.vector_store %arg3[%c0_44, %c0_45], %161 {strides = array<i32>} : memref<8x256xf32, #tpu.memory_space<vmem>>, vector<8x256xf32>,
    return
  }
  func.func @transform_0(%arg0: i32, %arg1: memref<1xi32, #tpu.memory_space<smem>>) -> (i32, i32) {
    %c0_i32 = arith.constant 0 : i32
    %c0_i32_0 = arith.constant 0 : i32
    return %arg0, %c0_i32 : i32, i32
  }
  func.func @transform_1(%arg0: i32, %arg1: memref<1xi32, #tpu.memory_space<smem>>) -> (i32, i32) {
    %c0_i32 = arith.constant 0 : i32
    %c0_i32_0 = arith.constant 0 : i32
    return %arg0, %c0_i32 : i32, i32
  }
}

</mosaic_0001>

<bundles_post_ra>
// kernel: tpu_custom_call.1
= control target key start
LH: loop header
LB: loop body
LE: loop exit
PB: predicated region body
PF: predicated region fallthrough
CT: control target
= control target key end

     0   :  { %8 = vsyncpa [#allocation5], 0  ;;  %s353_s0 = inlined_call_operand.<no memory space> [shape: s32[1], index: 0, kind: input, shape index: {}]   ;;  %s354_s1 = inlined_call_operand.hbm [shape: f32[8,256], index: 1, kind: input, shape index: {}]   ;;  %s355_s2 = inlined_call_operand.hbm [shape: f32[8,256], index: 2, kind: output, shape index: {}]  }
   0x1   :  { %9 = vsyncpa [#allocation6], 0  ;;  %s301_s9 = smov [#allocation4]   ;;  %s253_s13 = scalar_lea.hbm %s354_s1, 256 }
   0x2   :  { %s16_s10 = sshll.u32 %s301_s9, 4  ;;  %p254_p0 = scmp.ne.s32.totalorder %s354_s1, %s253_s13  ;;  %s17_s10 = int_to_ptr.vmem [resolvable:$true] %s16_s10 }
   0x3   :  { %p257_p1 = scmp.lt.u32.totalorder %s253_s13, %s354_s1 }
   0x5   :  { %p259_p2 = pnand %p257_p1, %p254_p0 }
   0x7   :  { %262 = shalt.err (!%p259_p2)
}
   0x8   :  { %s263_s18 = scalar_lea.vmem %s17_s10, 256  ;;  %p268_p4 = scmp.lt.s32.totalorder %s17_s10, %s17_s10 }
   0x9   :  { %p264_p3 = scmp.ne.s32.totalorder %s17_s10, %s263_s18  ;;  %p269_p5 = scmp.lt.s32.totalorder %s263_s18, %s263_s18 }
   0xb   :  { %p270_p6 = por %p269_p5, %p268_p4 }
   0xd   :  { %p271_p7 = pnand %p270_p6, %p264_p3 }
   0xf   :  { %274 = shalt.err (!%p271_p7)
}
  0x10   :  { %19 = dma.hbm_to_vmem [thread:$0]  %s354_s1, 256, %s17_s10, [#allocation5]  }
  0x11   :  { %297 = dma.done.wait [#allocation5], 256  }
  0x12   :  { %298 = vsyncadd [#allocation5], 4294967040  ;;  %v24_v0 = vlaneseq  ;;  %s35_s23 = smul.u32 2654435769, %s353_s0  ;;  %s302_s0 = smov [#allocation7]  }
  0x13   :  { %s240_s1 = sshll.u32 %s302_s0, 4  ;;  %s241_s1 = int_to_ptr.vmem [resolvable:$true] %s240_s1 }
  0x14   :  { %v25_v1 = vshrl.u32 %v24_v0, 7  ;;  %v27_v2 = vand.u32 127, %v24_v0  ;;  %s36_s24 = sadd.s32 2135587861, %s35_s23  ;;  %s275_s25 = scalar_lea.vmem %s241_s1, 256 }
  0x15   :  { %v37_v5 = vstv %s36_s24  ;;  %p276_p8 = scmp.ne.s32.totalorder %s241_s1, %s275_s25  ;;  %p280_p9 = scmp.lt.s32.totalorder %s241_s1, %s241_s1 }
  0x16   :  { %v31_v3 = vmul.u32 256, %v25_v1  ;;  %v28_v4 = vadd.s32 128, %v27_v2  ;;  %p281_p10 = scmp.lt.s32.totalorder %s275_s25, %s275_s25 }
  0x18   :  { %v32_v6 = vadd.s32 %v31_v3, %v27_v2  ;;  %v33_v7 = vadd.s32 %v31_v3, %v28_v4  ;;  %p282_p11 = por %p281_p10, %p280_p9 }
  0x1a   :  { %v38_v8 = vxor.u32 %v37_v5, %v32_v6  ;;  %v333_v9 = vxor.u32 %v37_v5, %v33_v7  ;;  %p283_p12 = pnand %p282_p11, %p276_p8 }
  0x1c   :  { %v40_v10 = vadd.s32 2654435769, %v38_v8  ;;  %v70_v11 = vadd.s32 1013904242, %v38_v8  ;;  %v100_v12 = vadd.s32 3668340011, %v38_v8 }
  0x1d   :  { %v130_v13 = vadd.s32 2027808484, %v38_v8  ;;  %v160_v14 = vadd.s32 387276957, %v38_v8  ;;  %v190_v15 = vadd.s32 3041712726, %v38_v8 }
  0x1e   :  { %v42_v16 = vshrl.u32 %v40_v10, 16  ;;  %v72_v17 = vshrl.u32 %v70_v11, 16  ;;  %v102_v18 = vshrl.u32 %v100_v12, 16  ;;  %v41_v19 = vadd.s32 2654435769, %v333_v9 }
  0x1f   :  { %v132_v20 = vshrl.u32 %v130_v13, 16  ;;  %v162_v21 = vshrl.u32 %v160_v14, 16  ;;  %v192_v22 = vshrl.u32 %v190_v15, 16  ;;  %v71_v23 = vadd.s32 1013904242, %v333_v9 }
  0x20   :  { %v44_v24 = vxor.u32 %v42_v16, %v40_v10  ;;  %v74_v25 = vxor.u32 %v72_v17, %v70_v11  ;;  %v104_v26 = vxor.u32 %v102_v18, %v100_v12  ;;  %v43_v27 = vshrl.u32 %v41_v19, 16 }
  0x21   :  { %v134_v28 = vxor.u32 %v132_v20, %v130_v13  ;;  %v164_v29 = vxor.u32 %v162_v21, %v160_v14  ;;  %v194_v30 = vxor.u32 %v192_v22, %v190_v15  ;;  %v73_v31 = vshrl.u32 %v71_v23, 16 }
  0x22   :  { %v46_v32 = vmul.u32 2246822507, %v44_v24  ;;  %v76_v33 = vmul.u32 2246822507, %v74_v25  ;;  %v45_v34 = vxor.u32 %v43_v27, %v41_v19  ;;  %v101_v11 = vadd.s32 3668340011, %v333_v9 }
  0x23   :  { %v106_v35 = vmul.u32 2246822507, %v104_v26  ;;  %v136_v36 = vmul.u32 2246822507, %v134_v28  ;;  %v75_v37 = vxor.u32 %v73_v31, %v71_v23  ;;  %v131_v19 = vadd.s32 2027808484, %v333_v9 }
  0x24   :  { %v48_v38 = vshrl.u32 %v46_v32, 13  ;;  %v78_v39 = vshrl.u32 %v76_v33, 13  ;;  %v166_v40 = vmul.u32 2246822507, %v164_v29  ;;  %v196_v41 = vmul.u32 2246822507, %v194_v30 }
  0x25   :  { %v108_v42 = vshrl.u32 %v106_v35, 13  ;;  %v138_v43 = vshrl.u32 %v136_v36, 13  ;;  %v47_v44 = vmul.u32 2246822507, %v45_v34  ;;  %v77_v45 = vmul.u32 2246822507, %v75_v37 }
  0x26   :  { %v50_v46 = vxor.u32 %v48_v38, %v46_v32  ;;  %v80_v47 = vxor.u32 %v78_v39, %v76_v33  ;;  %v168_v48 = vshrl.u32 %v166_v40, 13  ;;  %v198_v49 = vshrl.u32 %v196_v41, 13 }
  0x27   :  { %v110_v50 = vxor.u32 %v108_v42, %v106_v35  ;;  %v140_v51 = vxor.u32 %v138_v43, %v136_v36  ;;  %v49_v52 = vshrl.u32 %v47_v44, 13  ;;  %v79_v53 = vshrl.u32 %v77_v45, 13 }
  0x28   :  { %v52_v54 = vmul.u32 3266489909, %v50_v46  ;;  %v82_v55 = vmul.u32 3266489909, %v80_v47  ;;  %v170_v56 = vxor.u32 %v168_v48, %v166_v40  ;;  %v200_v57 = vxor.u32 %v198_v49, %v196_v41 }
  0x29   :  { %v112_v58 = vmul.u32 3266489909, %v110_v50  ;;  %v142_v59 = vmul.u32 3266489909, %v140_v51  ;;  %v51_v60 = vxor.u32 %v49_v52, %v47_v44  ;;  %v81_v61 = vxor.u32 %v79_v53, %v77_v45 }
  0x2a   :  { %v54_v62 = vshrl.u32 %v52_v54, 16  ;;  %v84_v63 = vshrl.u32 %v82_v55, 16  ;;  %v172_v2 = vmul.u32 3266489909, %v170_v56  ;;  %v202_v8 = vmul.u32 3266489909, %v200_v57 }
  0x2b   :  { %v114_v0 = vshrl.u32 %v112_v58, 16  ;;  %v144_v1 = vshrl.u32 %v142_v59, 16  ;;  %v53_v3 = vmul.u32 3266489909, %v51_v60  ;;  %v83_v6 = vmul.u32 3266489909, %v81_v61 }
  0x2c   :  { %v56_v4 = vxor.u32 %v54_v62, %v52_v54  ;;  %v86_v5 = vxor.u32 %v84_v63, %v82_v55  ;;  %v174_v18 = vshrl.u32 %v172_v2, 16  ;;  %v204_v24 = vshrl.u32 %v202_v8, 16 }
  0x2d   :  { %v116_v7 = vxor.u32 %v114_v0, %v112_v58  ;;  %v55_v10 = vshrl.u32 %v53_v3, 16  ;;  %v146_v17 = vxor.u32 %v144_v1, %v142_v59  ;;  %v85_v23 = vshrl.u32 %v83_v6, 16 }
  0x2e   :  { %v58_v12 = vand.u32 65535, %v56_v4  ;;  %v62_v13 = vshrl.u32 %v56_v4, 16  ;;  %v88_v14 = vand.u32 65535, %v86_v5  ;;  %v92_v15 = vshrl.u32 %v86_v5, 16 }
  0x2f   :  { %v118_v16 = vand.u32 65535, %v116_v7  ;;  %v122_v27 = vshrl.u32 %v116_v7, 16  ;;  %v57_v28 = vxor.u32 %v55_v10, %v53_v3  ;;  %v148_v30 = vand.u32 65535, %v146_v17 }
  0x30   :  { %v60_v20 = vcvt.s32.f32 %v58_v12  ;;  %v64_v21 = vcvt.s32.f32 %v62_v13  ;;  %v90_v22 = vcvt.s32.f32 %v88_v14  ;;  %v94_v26 = vcvt.s32.f32 %v92_v15 }
  0x31   :  { %v120_v29 = vcvt.s32.f32 %v118_v16  ;;  %v152_v31 = vshrl.u32 %v146_v17, 16  ;;  %v176_v32 = vxor.u32 %v174_v18, %v172_v2  ;;  %v87_v34 = vxor.u32 %v85_v23, %v83_v6 }
  0x32   :  { %v68_v25 = vadd.f32 %v64_v21, %v60_v20  ;;  %v103_v35 = vshrl.u32 %v101_v11, 16  ;;  %v133_v36 = vshrl.u32 %v131_v19, 16  ;;  %v59_v37 = vand.u32 65535, %v57_v28 }
  0x33   :  { %v63_v38 = vshrl.u32 %v57_v28, 16  ;;  %v161_v39 = vadd.s32 387276957, %v333_v9  ;;  %v124_v41 = vcvt.s32.f32 %v122_v27  ;;  %v206_v42 = vxor.u32 %v204_v24, %v202_v8 }
  0x34   :  { %v96_v33 = vadd.f32 %v90_v22, %v68_v25  ;;  %v150_v43 = vcvt.s32.f32 %v148_v30  ;;  %v154_v44 = vcvt.s32.f32 %v152_v31  ;;  %v178_v45 = vand.u32 65535, %v176_v32 }
  0x35   :  { %v182_v46 = vshrl.u32 %v176_v32, 16  ;;  %v89_v48 = vand.u32 65535, %v87_v34  ;;  %v105_v49 = vxor.u32 %v103_v35, %v101_v11  ;;  %v135_v50 = vxor.u32 %v133_v36, %v131_v19 }
  0x36   :  { %v98_v40 = vadd.f32 %v96_v33, %v94_v26  ;;  %v61_v51 = vcvt.s32.f32 %v59_v37  ;;  %v65_v52 = vcvt.s32.f32 %v63_v38  ;;  %v163_v53 = vshrl.u32 %v161_v39, 16 }
  0x37   :  { %v191_v54 = vadd.s32 3041712726, %v333_v9  ;;  %v208_v56 = vand.u32 65535, %v206_v42  ;;  %v107_v57 = vmul.u32 2246822507, %v105_v49  ;;  %v180_v59 = vcvt.s32.f32 %v178_v45 }
  0x38   :  { %v126_v47 = vadd.f32 %v120_v29, %v98_v40  ;;  %v137_v58 = vmul.u32 2246822507, %v135_v50  ;;  %v212_v60 = vshrl.u32 %v206_v42, 16  ;;  %v165_v61 = vxor.u32 %v163_v53, %v161_v39 }
  0x39   :  { %v193_v62 = vshrl.u32 %v191_v54, 16  ;;  %v91_v0 = vcvt.s32.f32 %v89_v48  ;;  %v109_v1 = vshrl.u32 %v107_v57, 13  ;;  %v69_v3 = vadd.f32 %v65_v52, %v61_v51  ;;  %v226_v52 = vld [vmem:[#allocation4] sm:$0xff] }
  0x3a   :  { %v128_v55 = vadd.f32 %v126_v47, %v124_v41  ;;  %v139_v2 = vshrl.u32 %v137_v58, 13  ;;  %v93_v4 = vshrl.u32 %v87_v34, 16  ;;  %v167_v5 = vmul.u32 2246822507, %v165_v61 }
  0x3b   :  { %v195_v6 = vxor.u32 %v193_v62, %v191_v54  ;;  %v184_v8 = vcvt.s32.f32 %v182_v46  ;;  %v111_v10 = vxor.u32 %v109_v1, %v107_v57  ;;  %v210_v14 = vcvt.s32.f32 %v208_v56 }
  0x3c   :  { %v156_v63 = vadd.f32 %v150_v43, %v128_v55  ;;  %v141_v9 = vxor.u32 %v139_v2, %v137_v58  ;;  %v169_v11 = vshrl.u32 %v167_v5, 13  ;;  %v95_v17 = vcvt.s32.f32 %v93_v4 }
  0x3d   :  { %v197_v12 = vmul.u32 2246822507, %v195_v6  ;;  %v113_v15 = vmul.u32 3266489909, %v111_v10  ;;  %v97_v18 = vadd.f32 %v91_v0, %v69_v3  ;;  %v214_v22 = vcvt.s32.f32 %v212_v60  ;;  %v227_v6 = vld [vmem:[#allocation4 + $0x8] sm:$0xff] }
  0x3e   :  { %v158_v7 = vadd.f32 %v156_v63, %v154_v44  ;;  %v143_v16 = vmul.u32 3266489909, %v141_v9  ;;  %v171_v19 = vxor.u32 %v169_v11, %v167_v5 }
  0x3f   :  { %v199_v20 = vshrl.u32 %v197_v12, 13  ;;  %v115_v23 = vshrl.u32 %v113_v15, 16  ;;  %v99_v30 = vadd.f32 %v97_v18, %v95_v17 }
  0x40   :  { %v186_v13 = vadd.f32 %v180_v59, %v158_v7  ;;  %v145_v24 = vshrl.u32 %v143_v16, 16  ;;  %v173_v25 = vmul.u32 3266489909, %v171_v19 }
  0x41   :  { %v201_v26 = vxor.u32 %v199_v20, %v197_v12  ;;  %v117_v28 = vxor.u32 %v115_v23, %v113_v15 }
  0x42   :  { %v188_v21 = vadd.f32 %v186_v13, %v184_v8  ;;  %v147_v29 = vxor.u32 %v145_v24, %v143_v16  ;;  %v175_v31 = vshrl.u32 %v173_v25, 16 }
  0x43   :  { %v203_v32 = vmul.u32 3266489909, %v201_v26  ;;  %v119_v34 = vand.u32 65535, %v117_v28  ;;  %v123_v35 = vshrl.u32 %v117_v28, 16 }
  0x44   :  { %v216_v27 = vadd.f32 %v210_v14, %v188_v21  ;;  %v149_v36 = vand.u32 65535, %v147_v29  ;;  %v177_v37 = vxor.u32 %v175_v31, %v173_v25  ;;  %v153_v42 = vshrl.u32 %v147_v29, 16 }
  0x45   :  { %v205_v38 = vshrl.u32 %v203_v32, 16  ;;  %v121_v40 = vcvt.s32.f32 %v119_v34  ;;  %v125_v41 = vcvt.s32.f32 %v123_v35 }
  0x46   :  { %v218_v33 = vadd.f32 %v216_v27, %v214_v22  ;;  %v151_v43 = vcvt.s32.f32 %v149_v36  ;;  %v179_v46 = vand.u32 65535, %v177_v37  ;;  %v155_v50 = vcvt.s32.f32 %v153_v42 }
  0x47   :  { %v127_v45 = vadd.f32 %v121_v40, %v99_v30  ;;  %v207_v47 = vxor.u32 %v205_v38, %v203_v32  ;;  %v183_v51 = vshrl.u32 %v177_v37, 16 }
  0x48   :  { %v220_v39 = vadd.f32 6.0, %v218_v33  ;;  %v181_v55 = vcvt.s32.f32 %v179_v46 }
  0x49   :  { %v129_v49 = vadd.f32 %v127_v45, %v125_v41  ;;  %v209_v56 = vand.u32 65535, %v207_v47  ;;  %v185_v59 = vcvt.s32.f32 %v183_v51  ;;  %v213_v60 = vshrl.u32 %v207_v47, 16 }
  0x4a   :  { %v222_v44 = vmul.f32 1.5258789e-05, %v220_v39 }
  0x4b   :  { %v157_v54 = vadd.f32 %v151_v43, %v129_v49  ;;  %v211_v62 = vcvt.s32.f32 %v209_v56  ;;  %v215_v0 = vcvt.s32.f32 %v213_v60 }
  0x4c   :  { %v249_v48 = vadd.f32 -6.0, %v222_v44 }
  0x4d   :  { %v159_v58 = vadd.f32 %v157_v54, %v155_v50 }
  0x4e   :  { %v228_v53 = vmul.f32 0.1, %v249_v48 }
  0x4f   :  { %v187_v61 = vadd.f32 %v181_v55, %v159_v58 }
  0x50   :  { %v230_v57 = vadd.f32 %v228_v53, %v226_v52 }
  0x51   :  { %v189_v63 = vadd.f32 %v187_v61, %v185_v59 }
  0x52   :  { %232 = vst [vmem:[#allocation7] sm:$0xff] %v230_v57 }
  0x53   :  { %v217_v1 = vadd.f32 %v211_v62, %v189_v63 }
  0x55   :  { %v219_v2 = vadd.f32 %v217_v1, %v215_v0 }
  0x57   :  { %v221_v3 = vadd.f32 6.0, %v219_v2 }
  0x59   :  { %v223_v4 = vmul.f32 1.5258789e-05, %v221_v3 }
  0x5b   :  { %v250_v5 = vadd.f32 -6.0, %v223_v4 }
  0x5d   :  { %v229_v7 = vmul.f32 0.1, %v250_v5 }
  0x5f   :  { %v231_v8 = vadd.f32 %v229_v7, %v227_v6 }
  0x61   :  { %233 = vst [vmem:[#allocation7 + $0x8] sm:$0xff] %v231_v8 }
  0x62   :  { %286 = shalt.err (!%p283_p12)
}
  0x63   :  { %s287_s28 = scalar_lea.hbm %s355_s2, 256 }
  0x64   :  { %p288_p13 = scmp.ne.s32.totalorder %s355_s2, %s287_s28  ;;  %p291_p0 = scmp.lt.u32.totalorder %s287_s28, %s355_s2 }
  0x66   :  { %p293_p1 = pnand %p291_p0, %p288_p13 }
  0x68   :  { %296 = shalt.err (!%p293_p1)
}
  0x69   :  { %243 = dma.vmem_to_hbm [thread:$0]  %s241_s1, 256, %s355_s2, [#allocation6]  }
  0x6a   :  { %299 = dma.done.wait [#allocation6], 256  }
  0x6b   :  { %300 = vsyncadd [#allocation6], 4294967040 }
  0x6c   :  { %247 = vsyncpa [#allocation5], 1 }
  0x6d   :  { %248 = vsyncpa [#allocation6], 1 }

</bundles_post_ra>
